<compile_context>
chip_gen: v7x
topology: tpu7x:2x2x1
jax: 0.10.0
libtpu: 0.0.40
codegen_flags: <defaults>
</compile_context>

<pallas_src>
import functools

import jax
import jax.numpy as jnp
from jax import lax
from jax.experimental import pallas as pl
from jax.experimental.pallas import tpu as pltpu


_SIGN_MASK = 0x7FFFFFFF        # flip magnitude bits of negative floats
_NAN_KEY = 0x7FC00000          # > key(+inf): NaN ranks largest (torch)
_KNOCKED = -(2 ** 31)          # below every real key (real keys never hit it)


def _round_up(x: int, m: int) -> int:
    return ((x + m - 1) // m) * m


def _topk_kernel(x_ref, out_ref, *, chunk, top_k, n):
    # x_ref:   (rows_block, n) scores (any float dtype).
    # out_ref: (rows_block, 2*top_k) int32.
    #          [:, :top_k]  = order-preserving int32 keys of the top-k values
    #                         (descending);
    #          [:, top_k:]  = their indices.
    rows_block = x_ref.shape[0]
    n_chunks = rows_block // chunk

    # Loop-invariant iotas / constants: hoisted out of the chunk loop.
    lane_iota = lax.broadcasted_iota(jnp.int32, (chunk, n), 1)
    col_iota = lax.broadcasted_iota(jnp.int32, (chunk, 2 * top_k), 1)
    oob = jnp.int32(n)
    knocked = jnp.int32(_KNOCKED)
    sign_mask = jnp.int32(_SIGN_MASK)
    nan_key = jnp.int32(_NAN_KEY)

    @pl.loop(0, n_chunks)
    def _(c):
        r0 = pl.multiple_of(c * chunk, chunk)
        x = x_ref[pl.ds(r0, chunk), :].astype(jnp.float32)

        # One-time order-preserving f32 -> int32 key (NaN handling hoisted out
        # of the selection loop):  key(a) < key(b)  <=>  a < b.
        bits = pltpu.bitcast(x, jnp.int32)
        key = jnp.where(bits < 0, bits ^ sign_mask, bits)
        cur = jnp.where(jnp.isnan(x), nan_key, key)

        acc = jnp.zeros((chunk, 2 * top_k), jnp.int32)

        # top_k is small and static: fully unroll so adjacent cross-lane
        # reduces (XLU) can be scheduled back-to-back.
        for kk in range(top_k):
            m = jnp.max(cur, axis=1, keepdims=True)            # (chunk, 1)
            cand = jnp.where(cur == m, lane_iota, oob)
            arg = jnp.min(cand, axis=1, keepdims=True)         # lowest index
            acc = jnp.where(col_iota == kk, m, acc)             # key column kk
            acc = jnp.where(col_iota == (top_k + kk), arg, acc)  # idx column kk
            cur = jnp.where(lane_iota == arg, knocked, cur)     # knock out

        # Single lane-dense store per chunk (one merged writeback stream).
        out_ref[pl.ds(r0, chunk), :] = acc


@functools.partial(jax.jit, static_argnums=(1,))
def box_topk_pool(pool_score: jax.Array, top_k: int):
    """Pallas implementation of BoxTopKPool.forward.

    pool_score: (B, C, N) float array.
    Returns (values, indices), each (B, C, top_k); values sorted descending
    along the last axis (same dtype as the input), indices int32.
    """
    B, C, N = pool_score.shape
    assert 0 < top_k <= N
    orig_dtype = pool_score.dtype

    R = B * C
    x = pool_score.reshape(R, N)            # free: no pad, no copy

    # Rows per inner pl.loop step: keep cur/lane_iota/acc around <=16 vregs so
    # the fully unrolled selection loop stays in registers (no spills).
    lane_tiles = pl.cdiv(N, 128)
    chunk = max(8, min(32, (32 // lane_tiles) // 8 * 8))
    chunk = min(chunk, _round_up(R, 8))

    # ---- row-tile (grid block) sizing, gated on chip VMEM -------------------
    try:
        vmem_cap = pltpu.get_tpu_info().vmem_capacity_bytes
    except Exception:
        vmem_cap = 64 << 20                                  # v7x per-TC floor
    vmem_limit = int(min((vmem_cap * 3) // 4, 96 << 20))     # 48 MiB v7x, 96 v5e/v6e
    in_buf_bytes = min(12 << 20, vmem_limit // 4)            # <=~24 MiB dbl-buffered

    bytes_per_row = N * x.dtype.itemsize
    target_rows = max(chunk, (in_buf_bytes // bytes_per_row) // chunk * chunk)

    g = pl.cdiv(R, target_rows)
    if R >= 2 * chunk:
        g = max(g, 2)            # >=2 grid steps so v7x's 2nd TensorCore works
    rows_block = _round_up(pl.cdiv(R, g), chunk)   # < chunk ghost rows / step
    grid = (pl.cdiv(R, rows_block),)

    kernel = functools.partial(_topk_kernel, chunk=chunk, top_k=top_k, n=N)

    packed = pl.pallas_call(
        kernel,
        out_shape=jax.ShapeDtypeStruct((R, 2 * top_k), jnp.int32),
        grid=grid,
        in_specs=[pl.BlockSpec((rows_block, N), lambda i: (i, 0))],
        out_specs=pl.BlockSpec((rows_block, 2 * top_k), lambda i: (i, 0)),
        compiler_params=pltpu.CompilerParams(
            dimension_semantics=("parallel",),
            vmem_limit_bytes=vmem_limit,
        ),
    )(x)

    # Tiny (R, top_k) unpack: invert the order-preserving key back to float.
    keys = packed[:, :top_k]
    idx = packed[:, top_k:].reshape(B, C, top_k)
    vbits = jnp.where(keys < 0, keys ^ jnp.int32(_SIGN_MASK), keys)
    vals = lax.bitcast_convert_type(vbits, jnp.float32)
    vals = vals.astype(orig_dtype).reshape(B, C, top_k)
    return vals, idx
    # TODO(synk): torch.topk returns int64 indices; int32 is returned here
    # (TPU-native, covers realistic N).


if __name__ == "__main__":
    key = jax.random.PRNGKey(0)

    # Small shapes consistent with the module's forward (top-k over dim=2).
    B, C, N = 2, 4, 16
    TOP_K = 8
    pool_score = jax.random.uniform(key, (B, C, N), dtype=jnp.float32)

    vals, idx = box_topk_pool(pool_score, TOP_K)
    vals, idx = jax.block_until_ready((vals, idx))

    ref_vals, ref_idx = lax.top_k(pool_score, TOP_K)
    assert jnp.allclose(vals, ref_vals), "top-k values mismatch"
    assert jnp.array_equal(idx, ref_idx.astype(jnp.int32)), "top-k indices mismatch"

    # Second check: non-128-aligned N, multiple inner chunks, >=2 grid steps.
    B2, C2, N2, K2 = 2, 40, 300, 5
    ps2 = jax.random.normal(jax.random.PRNGKey(1), (B2, C2, N2), dtype=jnp.float32)
    v2, i2 = jax.block_until_ready(box_topk_pool(ps2, K2))
    rv2, ri2 = lax.top_k(ps2, K2)
    assert jnp.allclose(v2, rv2), "top-k values mismatch (case 2)"
    assert jnp.array_equal(i2, ri2.astype(jnp.int32)), "top-k indices mismatch (case 2)"

    print("KERNEL_OK")
</pallas_src>

<mosaic_0001>
module attributes {stable_mosaic.version = 11 : i64} {
  func.func @_topk_kernel(%arg0: i32, %arg1: memref<8x16xf32, #tpu.memory_space<vmem>>, %arg2: memref<8x16xi32, #tpu.memory_space<vmem>>) attributes {dimension_semantics = [#tpu.dimension_semantics<parallel>], iteration_bounds = array<i64: 1>, scalar_prefetch = 0 : i64, scratch_operands = 0 : i64, tpu.core_type = #tpu.core_type<tc>, window_params = [{transform_indices = @transform_0, window_bounds = array<i64: 8, 16>}, {transform_indices = @transform_1, window_bounds = array<i64: 8, 16>}]} {
    %0 = tpu.iota {dimensions = array<i32: 1>} : vector<8x16xi32>
    %1 = tpu.iota {dimensions = array<i32: 1>} : vector<8x16xi32>
    %c2147483647_i32 = arith.constant 2147483647 : i32
    %c2143289344_i32 = arith.constant 2143289344 : i32
    %c16_i32 = arith.constant 16 : i32
    %c-2147483648_i32 = arith.constant -2147483648 : i32
    %c0_i32 = arith.constant 0 : i32
    %c1_i32 = arith.constant 1 : i32
    %2 = arith.muli %c0_i32, %c1_i32 : i32
    %c0_i32_0 = arith.constant 0 : i32
    %3 = arith.addi %c0_i32_0, %2 : i32
    %c8_i32 = arith.constant 8 : i32
    %4 = arith.muli %3, %c8_i32 : i32
    %5 = tpu.assume_multiple %4, 8 : i32
    %6 = arith.index_cast %5 : i32 to index
    %c0 = arith.constant 0 : index
    %7 = vector.load %arg1[%6, %c0] : memref<8x16xf32, #tpu.memory_space<vmem>>, vector<8x16xf32>
    %8 = tpu.bitcast %7 : vector<8x16xf32> -> vector<8x16xi32>
    %c0_i32_1 = arith.constant 0 : i32
    %9 = vector.broadcast %c0_i32_1 : i32 to vector<8x16xi32>
    %10 = arith.cmpi slt, %8, %9 : vector<8x16xi32>
    %11 = vector.broadcast %c2147483647_i32 : i32 to vector<8x16xi32>
    %12 = arith.xori %8, %11 : vector<8x16xi32>
    %13 = arith.select %10, %12, %8 : vector<8x16xi1>, vector<8x16xi32>
    %14 = arith.cmpf one, %7, %7 : vector<8x16xf32>
    %15 = vector.broadcast %c2143289344_i32 : i32 to vector<8x16xi32>
    %16 = arith.select %14, %15, %13 : vector<8x16xi1>, vector<8x16xi32>
    %c0_i32_2 = arith.constant 0 : i32
    %17 = vector.broadcast %c0_i32_2 : i32 to vector<8x16xi32>
    %cst = arith.constant dense<-2147483648> : vector<8xi32>
    %18 = vector.multi_reduction <maxsi>, %16, %cst [1] : vector<8x16xi32> to vector<8xi32>
    %19 = vector.shape_cast %18 : vector<8xi32> to vector<8x1xi32>
    %20 = vector.broadcast %19 : vector<8x1xi32> to vector<8x16xi32>
    %21 = arith.cmpi eq, %16, %20 : vector<8x16xi32>
    %22 = vector.broadcast %c16_i32 : i32 to vector<8x16xi32>
    %23 = arith.select %21, %0, %22 : vector<8x16xi1>, vector<8x16xi32>
    %cst_3 = arith.constant dense<2147483647> : vector<8xi32>
    %24 = vector.multi_reduction <minsi>, %23, %cst_3 [1] : vector<8x16xi32> to vector<8xi32>
    %25 = vector.shape_cast %24 : vector<8xi32> to vector<8x1xi32>
    %c0_i32_4 = arith.constant 0 : i32
    %26 = vector.broadcast %c0_i32_4 : i32 to vector<8x16xi32>
    %27 = arith.cmpi eq, %1, %26 : vector<8x16xi32>
    %28 = vector.shape_cast %19 : vector<8x1xi32> to vector<8x1xi32>
    %29 = vector.broadcast %28 : vector<8x1xi32> to vector<8x16xi32>
    %30 = arith.select %27, %29, %17 : vector<8x16xi1>, vector<8x16xi32>
    %c8_i32_5 = arith.constant 8 : i32
    %31 = vector.broadcast %c8_i32_5 : i32 to vector<8x16xi32>
    %32 = arith.cmpi eq, %1, %31 : vector<8x16xi32>
    %33 = vector.shape_cast %25 : vector<8x1xi32> to vector<8x1xi32>
    %34 = vector.broadcast %33 : vector<8x1xi32> to vector<8x16xi32>
    %35 = arith.select %32, %34, %30 : vector<8x16xi1>, vector<8x16xi32>
    %36 = vector.broadcast %25 : vector<8x1xi32> to vector<8x16xi32>
    %37 = arith.cmpi eq, %0, %36 : vector<8x16xi32>
    %38 = vector.broadcast %c-2147483648_i32 : i32 to vector<8x16xi32>
    %39 = arith.select %37, %38, %16 : vector<8x16xi1>, vector<8x16xi32>
    %cst_6 = arith.constant dense<-2147483648> : vector<8xi32>
    %40 = vector.multi_reduction <maxsi>, %39, %cst_6 [1] : vector<8x16xi32> to vector<8xi32>
    %41 = vector.shape_cast %40 : vector<8xi32> to vector<8x1xi32>
    %42 = vector.broadcast %41 : vector<8x1xi32> to vector<8x16xi32>
    %43 = arith.cmpi eq, %39, %42 : vector<8x16xi32>
    %44 = vector.broadcast %c16_i32 : i32 to vector<8x16xi32>
    %45 = arith.select %43, %0, %44 : vector<8x16xi1>, vector<8x16xi32>
    %cst_7 = arith.constant dense<2147483647> : vector<8xi32>
    %46 = vector.multi_reduction <minsi>, %45, %cst_7 [1] : vector<8x16xi32> to vector<8xi32>
    %47 = vector.shape_cast %46 : vector<8xi32> to vector<8x1xi32>
    %c1_i32_8 = arith.constant 1 : i32
    %48 = vector.broadcast %c1_i32_8 : i32 to vector<8x16xi32>
    %49 = arith.cmpi eq, %1, %48 : vector<8x16xi32>
    %50 = vector.shape_cast %41 : vector<8x1xi32> to vector<8x1xi32>
    %51 = vector.broadcast %50 : vector<8x1xi32> to vector<8x16xi32>
    %52 = arith.select %49, %51, %35 : vector<8x16xi1>, vector<8x16xi32>
    %c9_i32 = arith.constant 9 : i32
    %53 = vector.broadcast %c9_i32 : i32 to vector<8x16xi32>
    %54 = arith.cmpi eq, %1, %53 : vector<8x16xi32>
    %55 = vector.shape_cast %47 : vector<8x1xi32> to vector<8x1xi32>
    %56 = vector.broadcast %55 : vector<8x1xi32> to vector<8x16xi32>
    %57 = arith.select %54, %56, %52 : vector<8x16xi1>, vector<8x16xi32>
    %58 = vector.broadcast %47 : vector<8x1xi32> to vector<8x16xi32>
    %59 = arith.cmpi eq, %0, %58 : vector<8x16xi32>
    %60 = vector.broadcast %c-2147483648_i32 : i32 to vector<8x16xi32>
    %61 = arith.select %59, %60, %39 : vector<8x16xi1>, vector<8x16xi32>
    %cst_9 = arith.constant dense<-2147483648> : vector<8xi32>
    %62 = vector.multi_reduction <maxsi>, %61, %cst_9 [1] : vector<8x16xi32> to vector<8xi32>
    %63 = vector.shape_cast %62 : vector<8xi32> to vector<8x1xi32>
    %64 = vector.broadcast %63 : vector<8x1xi32> to vector<8x16xi32>
    %65 = arith.cmpi eq, %61, %64 : vector<8x16xi32>
    %66 = vector.broadcast %c16_i32 : i32 to vector<8x16xi32>
    %67 = arith.select %65, %0, %66 : vector<8x16xi1>, vector<8x16xi32>
    %cst_10 = arith.constant dense<2147483647> : vector<8xi32>
    %68 = vector.multi_reduction <minsi>, %67, %cst_10 [1] : vector<8x16xi32> to vector<8xi32>
    %69 = vector.shape_cast %68 : vector<8xi32> to vector<8x1xi32>
    %c2_i32 = arith.constant 2 : i32
    %70 = vector.broadcast %c2_i32 : i32 to vector<8x16xi32>
    %71 = arith.cmpi eq, %1, %70 : vector<8x16xi32>
    %72 = vector.shape_cast %63 : vector<8x1xi32> to vector<8x1xi32>
    %73 = vector.broadcast %72 : vector<8x1xi32> to vector<8x16xi32>
    %74 = arith.select %71, %73, %57 : vector<8x16xi1>, vector<8x16xi32>
    %c10_i32 = arith.constant 10 : i32
    %75 = vector.broadcast %c10_i32 : i32 to vector<8x16xi32>
    %76 = arith.cmpi eq, %1, %75 : vector<8x16xi32>
    %77 = vector.shape_cast %69 : vector<8x1xi32> to vector<8x1xi32>
    %78 = vector.broadcast %77 : vector<8x1xi32> to vector<8x16xi32>
    %79 = arith.select %76, %78, %74 : vector<8x16xi1>, vector<8x16xi32>
    %80 = vector.broadcast %69 : vector<8x1xi32> to vector<8x16xi32>
    %81 = arith.cmpi eq, %0, %80 : vector<8x16xi32>
    %82 = vector.broadcast %c-2147483648_i32 : i32 to vector<8x16xi32>
    %83 = arith.select %81, %82, %61 : vector<8x16xi1>, vector<8x16xi32>
    %cst_11 = arith.constant dense<-2147483648> : vector<8xi32>
    %84 = vector.multi_reduction <maxsi>, %83, %cst_11 [1] : vector<8x16xi32> to vector<8xi32>
    %85 = vector.shape_cast %84 : vector<8xi32> to vector<8x1xi32>
    %86 = vector.broadcast %85 : vector<8x1xi32> to vector<8x16xi32>
    %87 = arith.cmpi eq, %83, %86 : vector<8x16xi32>
    %88 = vector.broadcast %c16_i32 : i32 to vector<8x16xi32>
    %89 = arith.select %87, %0, %88 : vector<8x16xi1>, vector<8x16xi32>
    %cst_12 = arith.constant dense<2147483647> : vector<8xi32>
    %90 = vector.multi_reduction <minsi>, %89, %cst_12 [1] : vector<8x16xi32> to vector<8xi32>
    %91 = vector.shape_cast %90 : vector<8xi32> to vector<8x1xi32>
    %c3_i32 = arith.constant 3 : i32
    %92 = vector.broadcast %c3_i32 : i32 to vector<8x16xi32>
    %93 = arith.cmpi eq, %1, %92 : vector<8x16xi32>
    %94 = vector.shape_cast %85 : vector<8x1xi32> to vector<8x1xi32>
    %95 = vector.broadcast %94 : vector<8x1xi32> to vector<8x16xi32>
    %96 = arith.select %93, %95, %79 : vector<8x16xi1>, vector<8x16xi32>
    %c11_i32 = arith.constant 11 : i32
    %97 = vector.broadcast %c11_i32 : i32 to vector<8x16xi32>
    %98 = arith.cmpi eq, %1, %97 : vector<8x16xi32>
    %99 = vector.shape_cast %91 : vector<8x1xi32> to vector<8x1xi32>
    %100 = vector.broadcast %99 : vector<8x1xi32> to vector<8x16xi32>
    %101 = arith.select %98, %100, %96 : vector<8x16xi1>, vector<8x16xi32>
    %102 = vector.broadcast %91 : vector<8x1xi32> to vector<8x16xi32>
    %103 = arith.cmpi eq, %0, %102 : vector<8x16xi32>
    %104 = vector.broadcast %c-2147483648_i32 : i32 to vector<8x16xi32>
    %105 = arith.select %103, %104, %83 : vector<8x16xi1>, vector<8x16xi32>
    %cst_13 = arith.constant dense<-2147483648> : vector<8xi32>
    %106 = vector.multi_reduction <maxsi>, %105, %cst_13 [1] : vector<8x16xi32> to vector<8xi32>
    %107 = vector.shape_cast %106 : vector<8xi32> to vector<8x1xi32>
    %108 = vector.broadcast %107 : vector<8x1xi32> to vector<8x16xi32>
    %109 = arith.cmpi eq, %105, %108 : vector<8x16xi32>
    %110 = vector.broadcast %c16_i32 : i32 to vector<8x16xi32>
    %111 = arith.select %109, %0, %110 : vector<8x16xi1>, vector<8x16xi32>
    %cst_14 = arith.constant dense<2147483647> : vector<8xi32>
    %112 = vector.multi_reduction <minsi>, %111, %cst_14 [1] : vector<8x16xi32> to vector<8xi32>
    %113 = vector.shape_cast %112 : vector<8xi32> to vector<8x1xi32>
    %c4_i32 = arith.constant 4 : i32
    %114 = vector.broadcast %c4_i32 : i32 to vector<8x16xi32>
    %115 = arith.cmpi eq, %1, %114 : vector<8x16xi32>
    %116 = vector.shape_cast %107 : vector<8x1xi32> to vector<8x1xi32>
    %117 = vector.broadcast %116 : vector<8x1xi32> to vector<8x16xi32>
    %118 = arith.select %115, %117, %101 : vector<8x16xi1>, vector<8x16xi32>
    %c12_i32 = arith.constant 12 : i32
    %119 = vector.broadcast %c12_i32 : i32 to vector<8x16xi32>
    %120 = arith.cmpi eq, %1, %119 : vector<8x16xi32>
    %121 = vector.shape_cast %113 : vector<8x1xi32> to vector<8x1xi32>
    %122 = vector.broadcast %121 : vector<8x1xi32> to vector<8x16xi32>
    %123 = arith.select %120, %122, %118 : vector<8x16xi1>, vector<8x16xi32>
    %124 = vector.broadcast %113 : vector<8x1xi32> to vector<8x16xi32>
    %125 = arith.cmpi eq, %0, %124 : vector<8x16xi32>
    %126 = vector.broadcast %c-2147483648_i32 : i32 to vector<8x16xi32>
    %127 = arith.select %125, %126, %105 : vector<8x16xi1>, vector<8x16xi32>
    %cst_15 = arith.constant dense<-2147483648> : vector<8xi32>
    %128 = vector.multi_reduction <maxsi>, %127, %cst_15 [1] : vector<8x16xi32> to vector<8xi32>
    %129 = vector.shape_cast %128 : vector<8xi32> to vector<8x1xi32>
    %130 = vector.broadcast %129 : vector<8x1xi32> to vector<8x16xi32>
    %131 = arith.cmpi eq, %127, %130 : vector<8x16xi32>
    %132 = vector.broadcast %c16_i32 : i32 to vector<8x16xi32>
    %133 = arith.select %131, %0, %132 : vector<8x16xi1>, vector<8x16xi32>
    %cst_16 = arith.constant dense<2147483647> : vector<8xi32>
    %134 = vector.multi_reduction <minsi>, %133, %cst_16 [1] : vector<8x16xi32> to vector<8xi32>
    %135 = vector.shape_cast %134 : vector<8xi32> to vector<8x1xi32>
    %c5_i32 = arith.constant 5 : i32
    %136 = vector.broadcast %c5_i32 : i32 to vector<8x16xi32>
    %137 = arith.cmpi eq, %1, %136 : vector<8x16xi32>
    %138 = vector.shape_cast %129 : vector<8x1xi32> to vector<8x1xi32>
    %139 = vector.broadcast %138 : vector<8x1xi32> to vector<8x16xi32>
    %140 = arith.select %137, %139, %123 : vector<8x16xi1>, vector<8x16xi32>
    %c13_i32 = arith.constant 13 : i32
    %141 = vector.broadcast %c13_i32 : i32 to vector<8x16xi32>
    %142 = arith.cmpi eq, %1, %141 : vector<8x16xi32>
    %143 = vector.shape_cast %135 : vector<8x1xi32> to vector<8x1xi32>
    %144 = vector.broadcast %143 : vector<8x1xi32> to vector<8x16xi32>
    %145 = arith.select %142, %144, %140 : vector<8x16xi1>, vector<8x16xi32>
    %146 = vector.broadcast %135 : vector<8x1xi32> to vector<8x16xi32>
    %147 = arith.cmpi eq, %0, %146 : vector<8x16xi32>
    %148 = vector.broadcast %c-2147483648_i32 : i32 to vector<8x16xi32>
    %149 = arith.select %147, %148, %127 : vector<8x16xi1>, vector<8x16xi32>
    %cst_17 = arith.constant dense<-2147483648> : vector<8xi32>
    %150 = vector.multi_reduction <maxsi>, %149, %cst_17 [1] : vector<8x16xi32> to vector<8xi32>
    %151 = vector.shape_cast %150 : vector<8xi32> to vector<8x1xi32>
    %152 = vector.broadcast %151 : vector<8x1xi32> to vector<8x16xi32>
    %153 = arith.cmpi eq, %149, %152 : vector<8x16xi32>
    %154 = vector.broadcast %c16_i32 : i32 to vector<8x16xi32>
    %155 = arith.select %153, %0, %154 : vector<8x16xi1>, vector<8x16xi32>
    %cst_18 = arith.constant dense<2147483647> : vector<8xi32>
    %156 = vector.multi_reduction <minsi>, %155, %cst_18 [1] : vector<8x16xi32> to vector<8xi32>
    %157 = vector.shape_cast %156 : vector<8xi32> to vector<8x1xi32>
    %c6_i32 = arith.constant 6 : i32
    %158 = vector.broadcast %c6_i32 : i32 to vector<8x16xi32>
    %159 = arith.cmpi eq, %1, %158 : vector<8x16xi32>
    %160 = vector.shape_cast %151 : vector<8x1xi32> to vector<8x1xi32>
    %161 = vector.broadcast %160 : vector<8x1xi32> to vector<8x16xi32>
    %162 = arith.select %159, %161, %145 : vector<8x16xi1>, vector<8x16xi32>
    %c14_i32 = arith.constant 14 : i32
    %163 = vector.broadcast %c14_i32 : i32 to vector<8x16xi32>
    %164 = arith.cmpi eq, %1, %163 : vector<8x16xi32>
    %165 = vector.shape_cast %157 : vector<8x1xi32> to vector<8x1xi32>
    %166 = vector.broadcast %165 : vector<8x1xi32> to vector<8x16xi32>
    %167 = arith.select %164, %166, %162 : vector<8x16xi1>, vector<8x16xi32>
    %168 = vector.broadcast %157 : vector<8x1xi32> to vector<8x16xi32>
    %169 = arith.cmpi eq, %0, %168 : vector<8x16xi32>
    %170 = vector.broadcast %c-2147483648_i32 : i32 to vector<8x16xi32>
    %171 = arith.select %169, %170, %149 : vector<8x16xi1>, vector<8x16xi32>
    %cst_19 = arith.constant dense<-2147483648> : vector<8xi32>
    %172 = vector.multi_reduction <maxsi>, %171, %cst_19 [1] : vector<8x16xi32> to vector<8xi32>
    %173 = vector.shape_cast %172 : vector<8xi32> to vector<8x1xi32>
    %174 = vector.broadcast %173 : vector<8x1xi32> to vector<8x16xi32>
    %175 = arith.cmpi eq, %171, %174 : vector<8x16xi32>
    %176 = vector.broadcast %c16_i32 : i32 to vector<8x16xi32>
    %177 = arith.select %175, %0, %176 : vector<8x16xi1>, vector<8x16xi32>
    %cst_20 = arith.constant dense<2147483647> : vector<8xi32>
    %178 = vector.multi_reduction <minsi>, %177, %cst_20 [1] : vector<8x16xi32> to vector<8xi32>
    %179 = vector.shape_cast %178 : vector<8xi32> to vector<8x1xi32>
    %c7_i32 = arith.constant 7 : i32
    %180 = vector.broadcast %c7_i32 : i32 to vector<8x16xi32>
    %181 = arith.cmpi eq, %1, %180 : vector<8x16xi32>
    %182 = vector.shape_cast %173 : vector<8x1xi32> to vector<8x1xi32>
    %183 = vector.broadcast %182 : vector<8x1xi32> to vector<8x16xi32>
    %184 = arith.select %181, %183, %167 : vector<8x16xi1>, vector<8x16xi32>
    %c15_i32 = arith.constant 15 : i32
    %185 = vector.broadcast %c15_i32 : i32 to vector<8x16xi32>
    %186 = arith.cmpi eq, %1, %185 : vector<8x16xi32>
    %187 = vector.shape_cast %179 : vector<8x1xi32> to vector<8x1xi32>
    %188 = vector.broadcast %187 : vector<8x1xi32> to vector<8x16xi32>
    %189 = arith.select %186, %188, %184 : vector<8x16xi1>, vector<8x16xi32>
    %190 = arith.index_cast %5 : i32 to index
    %c0_21 = arith.constant 0 : index
    %191 = vector.load %arg2[%190, %c0_21] : memref<8x16xi32, #tpu.memory_space<vmem>>, vector<8x16xi32>
    tpu.vector_store %arg2[%190, %c0_21], %189 {strides = array<i32>} : memref<8x16xi32, #tpu.memory_space<vmem>>, vector<8x16xi32>,
    %c1_i32_22 = arith.constant 1 : i32
    return
  }
  func.func @transform_0(%arg0: i32) -> (i32, i32) {
    %c0_i32 = arith.constant 0 : i32
    %c0_i32_0 = arith.constant 0 : i32
    return %arg0, %c0_i32 : i32, i32
  }
  func.func @transform_1(%arg0: i32) -> (i32, i32) {
    %c0_i32 = arith.constant 0 : i32
    %c0_i32_0 = arith.constant 0 : i32
    return %arg0, %c0_i32 : i32, i32
  }
}

</mosaic_0001>

<bundles_post_ra>
// kernel: box_topk_pool.1
= control target key start
LH: loop header
LB: loop body
LE: loop exit
PB: predicated region body
PF: predicated region fallthrough
CT: control target
= control target key end

     0   :  { %6 = vsyncpa [#allocation3], 0  ;;  %s363_s6 = smov [#allocation2]   ;;  %s439_s0 = inlined_call_operand.hbm [shape: f32[8,16], index: 0, kind: input, shape index: {}]   ;;  %s440_s1 = inlined_call_operand.vmem [shape: s32[8,16], index: 1, kind: output, shape index: {}]  }
   0x1   :  { %s13_s7 = sshll.u32 %s363_s6, 4  ;;  %s339_s10 = scalar_lea.hbm %s439_s0, 128  ;;  %s14_s7 = int_to_ptr.vmem [resolvable:$true] %s13_s7 }
   0x2   :  { %p340_p0 = scmp.ne.s32.totalorder %s439_s0, %s339_s10  ;;  %p343_p1 = scmp.lt.u32.totalorder %s339_s10, %s439_s0 }
   0x4   :  { %p345_p2 = pnand %p343_p1, %p340_p0 }
   0x6   :  { %348 = shalt.err (!%p345_p2)
}
   0x7   :  { %s349_s15 = scalar_lea.vmem %s14_s7, 128  ;;  %p354_p4 = scmp.lt.s32.totalorder %s14_s7, %s14_s7 }
   0x8   :  { %p350_p3 = scmp.ne.s32.totalorder %s14_s7, %s349_s15  ;;  %p355_p5 = scmp.lt.s32.totalorder %s349_s15, %s349_s15 }
   0xa   :  { %p356_p6 = por %p355_p5, %p354_p4 }
   0xc   :  { %p357_p7 = pnand %p356_p6, %p350_p3 }
   0xe   :  { %360 = shalt.err (!%p357_p7)
}
   0xf   :  { %16 = dma.hbm_to_vmem [thread:$0]  %s439_s0, 128, %s14_s7, [#allocation3]  }
  0x10   :  { %361 = dma.done.wait [#allocation3], 128  }
  0x11   :  { %362 = vsyncadd [#allocation3], 4294967168  ;;  %v22_v0 = vld [vmem:[#allocation2] sm:$0xff]  ;;  %vm29_vm2 = vcmask 130048   ;;  %v20_v12 = vlaneseq }
  0x12   :  { %v25_v1 = vxor.u32 2147483647, %v22_v0  ;;  %vm24_vm0 = vcmp.lt.s32.totalorder %v22_v0, 0  ;;  %vm27_vm1 = vcmp.ne.f32.partialorder %v22_v0, %v22_v0 }
  0x13   :  { %v387_v17 = vand.u32 127, %v20_v12 }
  0x14   :  { %v26_v2 = vsel %vm24_vm0, %v25_v1, %v22_v0 }
  0x15   :  { %v28_v3 = vsel %vm27_vm1, 2143289344, %v26_v2  ;;  %vm62_vm6 = vcmp.eq.s32.totalorder %v387_v17, 0  ;;  %vm64_vm7 = vcmp.eq.s32.totalorder %v387_v17, 8  ;;  %vm100_vm10 = vcmp.eq.s32.totalorder %v387_v17, 1 }
  0x16   :  { %v30_v4 = vsel %vm29_vm2, %v28_v3, 2147483648  ;;  %vm102_vm13 = vcmp.eq.s32.totalorder %v387_v17, 9  ;;  %vm138_vm0 = vcmp.eq.s32.totalorder %v387_v17, 2 }
  0x17   :  { %v32_v5 = vshra.s32 %v30_v4, 16  ;;  %v31_v7 = vand.u32 65535, %v30_v4 }
  0x19   :  { %v34_v6 = vcvt.s32.f32 %v32_v5  ;;  %v33_v8 = vcvt.s32.f32 %v31_v7 }
  0x1b   :  { %35 = vmax.xlane.f32.xlu0 %v34_v6 }
  0xa8   :  { %v36_v9 = vpop.xlane.xlu0 %35 }
  0xa9   :  { %vm37_vm3 = vcmp.eq.f32.partialorder %v34_v6, %v36_v9  ;;  %v42_v11 = vcvt.f32.s32 %v36_v9 }
  0xaa   :  { %v38_v10 = vsel %vm37_vm3, %v33_v8, -inf }
  0xab   :  { %39 = vmax.xlane.f32.xlu0 %v38_v10  ;;  %v43_v14 = vshll.u32 %v42_v11, 16 }
 0x138   :  { %v40_v13 = vpop.xlane.xlu0 %39 }
 0x139   :  { %v41_v15 = vcvt.f32.s32 %v40_v13 }
 0x13b   :  { %v44_v16 = vadd.s32 %v43_v14, %v41_v15 }
 0x13d   :  { %vm45_vm4 = vcmp.eq.s32.totalorder %v28_v3, %v44_v16  ;;  %v63_v31 = vsel %vm62_vm6, %v44_v16, 0 }
 0x13e   :  { %v46_v18 = vsel %vm45_vm4, %v387_v17, 16  ;;  %vm140_vm4 = vcmp.eq.s32.totalorder %v387_v17, 10 }
 0x13f   :  { %v47_v19 = vsel %vm29_vm2, %v46_v18, 2147483647 }
 0x140   :  { %v49_v20 = vshra.s32 %v47_v19, 16  ;;  %v48_v22 = vand.u32 65535, %v47_v19 }
 0x142   :  { %v51_v21 = vcvt.s32.f32 %v49_v20  ;;  %v50_v24 = vcvt.s32.f32 %v48_v22 }
 0x144   :  { %52 = vmin.xlane.f32.xlu1 %v51_v21 }
 0x1d1   :  { %v53_v23 = vpop.xlane.xlu1 %52 }
 0x1d2   :  { %vm54_vm5 = vcmp.eq.f32.partialorder %v51_v21, %v53_v23  ;;  %v59_v26 = vcvt.f32.s32 %v53_v23 }
 0x1d3   :  { %v55_v25 = vsel %vm54_vm5, %v50_v24, inf }
 0x1d4   :  { %56 = vmin.xlane.f32.xlu1 %v55_v25  ;;  %v60_v28 = vshll.u32 %v59_v26, 16 }
 0x261   :  { %v57_v27 = vpop.xlane.xlu1 %56 }
 0x262   :  { %v58_v29 = vcvt.f32.s32 %v57_v27 }
 0x264   :  { %v61_v30 = vadd.s32 %v60_v28, %v58_v29 }
 0x266   :  { %v65_v32 = vsel %vm64_vm7, %v61_v30, %v63_v31  ;;  %vm66_vm8 = vcmp.eq.s32.totalorder %v387_v17, %v61_v30  ;;  %vm176_vm7 = vcmp.eq.s32.totalorder %v387_v17, 3 }
 0x267   :  { %v67_v33 = vsel %vm66_vm8, 2147483648, %v28_v3 }
 0x268   :  { %v68_v34 = vsel %vm29_vm2, %v67_v33, 2147483648 }
 0x269   :  { %v70_v35 = vshra.s32 %v68_v34, 16  ;;  %v69_v37 = vand.u32 65535, %v68_v34 }
 0x26b   :  { %v72_v36 = vcvt.s32.f32 %v70_v35  ;;  %v71_v39 = vcvt.s32.f32 %v69_v37 }
 0x26d   :  { %73 = vmax.xlane.f32.xlu0 %v72_v36 }
 0x2fa   :  { %v74_v38 = vpop.xlane.xlu0 %73 }
 0x2fb   :  { %vm75_vm9 = vcmp.eq.f32.partialorder %v72_v36, %v74_v38  ;;  %v80_v41 = vcvt.f32.s32 %v74_v38 }
 0x2fc   :  { %v76_v40 = vsel %vm75_vm9, %v71_v39, -inf }
 0x2fd   :  { %77 = vmax.xlane.f32.xlu1 %v76_v40  ;;  %v81_v43 = vshll.u32 %v80_v41, 16 }
 0x38a   :  { %v78_v42 = vpop.xlane.xlu1 %77 }
 0x38b   :  { %v79_v44 = vcvt.f32.s32 %v78_v42 }
 0x38d   :  { %v82_v45 = vadd.s32 %v81_v43, %v79_v44 }
 0x38f   :  { %vm83_vm11 = vcmp.eq.s32.totalorder %v67_v33, %v82_v45  ;;  %v101_v46 = vsel %vm100_vm10, %v82_v45, %v65_v32  ;;  %vm178_vm10 = vcmp.eq.s32.totalorder %v387_v17, 11 }
 0x390   :  { %v84_v47 = vsel %vm83_vm11, %v387_v17, 16 }
 0x391   :  { %v85_v48 = vsel %vm29_vm2, %v84_v47, 2147483647 }
 0x392   :  { %v87_v49 = vshra.s32 %v85_v48, 16  ;;  %v86_v51 = vand.u32 65535, %v85_v48 }
 0x394   :  { %v89_v50 = vcvt.s32.f32 %v87_v49  ;;  %v88_v53 = vcvt.s32.f32 %v86_v51 }
 0x396   :  { %90 = vmin.xlane.f32.xlu0 %v89_v50 }
 0x423   :  { %v91_v52 = vpop.xlane.xlu0 %90 }
 0x424   :  { %vm92_vm12 = vcmp.eq.f32.partialorder %v89_v50, %v91_v52  ;;  %v97_v55 = vcvt.f32.s32 %v91_v52 }
 0x425   :  { %v93_v54 = vsel %vm92_vm12, %v88_v53, inf }
 0x426   :  { %94 = vmin.xlane.f32.xlu1 %v93_v54  ;;  %v98_v57 = vshll.u32 %v97_v55, 16 }
 0x4b3   :  { %v95_v56 = vpop.xlane.xlu1 %94 }
 0x4b4   :  { %v96_v58 = vcvt.f32.s32 %v95_v56 }
 0x4b6   :  { %v99_v59 = vadd.s32 %v98_v57, %v96_v58 }
 0x4b8   :  { %v103_v60 = vsel %vm102_vm13, %v99_v59, %v101_v46  ;;  %vm104_vm14 = vcmp.eq.s32.totalorder %v387_v17, %v99_v59  ;;  %vm214_vm13 = vcmp.eq.s32.totalorder %v387_v17, 4 }
 0x4b9   :  { %v105_v61 = vsel %vm104_vm14, 2147483648, %v67_v33 }
 0x4ba   :  { %v106_v62 = vsel %vm29_vm2, %v105_v61, 2147483648 }
 0x4bb   :  { %v108_v63 = vshra.s32 %v106_v62, 16  ;;  %v107_v1 = vand.u32 65535, %v106_v62 }
 0x4bd   :  { %v110_v0 = vcvt.s32.f32 %v108_v63  ;;  %v109_v3 = vcvt.s32.f32 %v107_v1 }
 0x4bf   :  { %111 = vmax.xlane.f32.xlu0 %v110_v0 }
 0x54c   :  { %v112_v2 = vpop.xlane.xlu0 %111 }
 0x54d   :  { %vm113_vm15 = vcmp.eq.f32.partialorder %v110_v0, %v112_v2  ;;  %v118_v5 = vcvt.f32.s32 %v112_v2 }
 0x54e   :  { %v114_v4 = vsel %vm113_vm15, %v109_v3, -inf }
 0x54f   :  { %115 = vmax.xlane.f32.xlu1 %v114_v4  ;;  %v119_v7 = vshll.u32 %v118_v5, 16 }
 0x5dc   :  { %v116_v6 = vpop.xlane.xlu1 %115 }
 0x5dd   :  { %v117_v8 = vcvt.f32.s32 %v116_v6 }
 0x5df   :  { %v120_v9 = vadd.s32 %v119_v7, %v117_v8 }
 0x5e1   :  { %vm121_vm1 = vcmp.eq.s32.totalorder %v105_v61, %v120_v9  ;;  %v139_v10 = vsel %vm138_vm0, %v120_v9, %v103_v60  ;;  %vm216_vm0 = vcmp.eq.s32.totalorder %v387_v17, 12 }
 0x5e2   :  { %v122_v11 = vsel %vm121_vm1, %v387_v17, 16 }
 0x5e3   :  { %v123_v12 = vsel %vm29_vm2, %v122_v11, 2147483647 }
 0x5e4   :  { %v125_v13 = vshra.s32 %v123_v12, 16  ;;  %v124_v15 = vand.u32 65535, %v123_v12 }
 0x5e6   :  { %v127_v14 = vcvt.s32.f32 %v125_v13  ;;  %v126_v18 = vcvt.s32.f32 %v124_v15 }
 0x5e8   :  { %128 = vmin.xlane.f32.xlu0 %v127_v14 }
 0x675   :  { %v129_v16 = vpop.xlane.xlu0 %128 }
 0x676   :  { %vm130_vm3 = vcmp.eq.f32.partialorder %v127_v14, %v129_v16  ;;  %v135_v20 = vcvt.f32.s32 %v129_v16 }
 0x677   :  { %v131_v19 = vsel %vm130_vm3, %v126_v18, inf }
 0x678   :  { %132 = vmin.xlane.f32.xlu1 %v131_v19  ;;  %v136_v22 = vshll.u32 %v135_v20, 16 }
 0x705   :  { %v133_v21 = vpop.xlane.xlu1 %132 }
 0x706   :  { %v134_v23 = vcvt.f32.s32 %v133_v21 }
 0x708   :  { %v137_v24 = vadd.s32 %v136_v22, %v134_v23 }
 0x70a   :  { %v141_v25 = vsel %vm140_vm4, %v137_v24, %v139_v10  ;;  %vm142_vm5 = vcmp.eq.s32.totalorder %v387_v17, %v137_v24  ;;  %vm252_vm4 = vcmp.eq.s32.totalorder %v387_v17, 5 }
 0x70b   :  { %v143_v26 = vsel %vm142_vm5, 2147483648, %v105_v61 }
 0x70c   :  { %v144_v27 = vsel %vm29_vm2, %v143_v26, 2147483648 }
 0x70d   :  { %v146_v28 = vshra.s32 %v144_v27, 16  ;;  %v145_v30 = vand.u32 65535, %v144_v27 }
 0x70f   :  { %v148_v29 = vcvt.s32.f32 %v146_v28  ;;  %v147_v32 = vcvt.s32.f32 %v145_v30 }
 0x711   :  { %149 = vmax.xlane.f32.xlu0 %v148_v29 }
 0x79e   :  { %v150_v31 = vpop.xlane.xlu0 %149 }
 0x79f   :  { %vm151_vm6 = vcmp.eq.f32.partialorder %v148_v29, %v150_v31  ;;  %v156_v34 = vcvt.f32.s32 %v150_v31 }
 0x7a0   :  { %v152_v33 = vsel %vm151_vm6, %v147_v32, -inf }
 0x7a1   :  { %153 = vmax.xlane.f32.xlu1 %v152_v33  ;;  %v157_v36 = vshll.u32 %v156_v34, 16 }
 0x82e   :  { %v154_v35 = vpop.xlane.xlu1 %153 }
 0x82f   :  { %v155_v37 = vcvt.f32.s32 %v154_v35 }
 0x831   :  { %v158_v38 = vadd.s32 %v157_v36, %v155_v37 }
 0x833   :  { %vm159_vm8 = vcmp.eq.s32.totalorder %v143_v26, %v158_v38  ;;  %v177_v39 = vsel %vm176_vm7, %v158_v38, %v141_v25  ;;  %vm254_vm7 = vcmp.eq.s32.totalorder %v387_v17, 13 }
 0x834   :  { %v160_v40 = vsel %vm159_vm8, %v387_v17, 16 }
 0x835   :  { %v161_v41 = vsel %vm29_vm2, %v160_v40, 2147483647 }
 0x836   :  { %v163_v42 = vshra.s32 %v161_v41, 16  ;;  %v162_v44 = vand.u32 65535, %v161_v41 }
 0x838   :  { %v165_v43 = vcvt.s32.f32 %v163_v42  ;;  %v164_v46 = vcvt.s32.f32 %v162_v44 }
 0x83a   :  { %166 = vmin.xlane.f32.xlu0 %v165_v43 }
 0x8c7   :  { %v167_v45 = vpop.xlane.xlu0 %166 }
 0x8c8   :  { %vm168_vm9 = vcmp.eq.f32.partialorder %v165_v43, %v167_v45  ;;  %v173_v48 = vcvt.f32.s32 %v167_v45 }
 0x8c9   :  { %v169_v47 = vsel %vm168_vm9, %v164_v46, inf }
 0x8ca   :  { %170 = vmin.xlane.f32.xlu1 %v169_v47  ;;  %v174_v50 = vshll.u32 %v173_v48, 16 }
 0x957   :  { %v171_v49 = vpop.xlane.xlu1 %170 }
 0x958   :  { %v172_v51 = vcvt.f32.s32 %v171_v49 }
 0x95a   :  { %v175_v52 = vadd.s32 %v174_v50, %v172_v51 }
 0x95c   :  { %v179_v53 = vsel %vm178_vm10, %v175_v52, %v177_v39  ;;  %vm180_vm11 = vcmp.eq.s32.totalorder %v387_v17, %v175_v52  ;;  %vm290_vm10 = vcmp.eq.s32.totalorder %v387_v17, 6 }
 0x95d   :  { %v181_v54 = vsel %vm180_vm11, 2147483648, %v143_v26 }
 0x95e   :  { %v182_v55 = vsel %vm29_vm2, %v181_v54, 2147483648 }
 0x95f   :  { %v184_v56 = vshra.s32 %v182_v55, 16  ;;  %v183_v58 = vand.u32 65535, %v182_v55 }
 0x961   :  { %v186_v57 = vcvt.s32.f32 %v184_v56  ;;  %v185_v60 = vcvt.s32.f32 %v183_v58 }
 0x963   :  { %187 = vmax.xlane.f32.xlu0 %v186_v57 }
 0x9f0   :  { %v188_v59 = vpop.xlane.xlu0 %187 }
 0x9f1   :  { %vm189_vm12 = vcmp.eq.f32.partialorder %v186_v57, %v188_v59  ;;  %v194_v62 = vcvt.f32.s32 %v188_v59 }
 0x9f2   :  { %v190_v61 = vsel %vm189_vm12, %v185_v60, -inf }
 0x9f3   :  { %191 = vmax.xlane.f32.xlu1 %v190_v61  ;;  %v195_v0 = vshll.u32 %v194_v62, 16 }
 0xa80   :  { %v192_v63 = vpop.xlane.xlu1 %191 }
 0xa81   :  { %v193_v1 = vcvt.f32.s32 %v192_v63 }
 0xa83   :  { %v196_v2 = vadd.s32 %v195_v0, %v193_v1 }
 0xa85   :  { %vm197_vm14 = vcmp.eq.s32.totalorder %v181_v54, %v196_v2  ;;  %v215_v3 = vsel %vm214_vm13, %v196_v2, %v179_v53  ;;  %vm292_vm13 = vcmp.eq.s32.totalorder %v387_v17, 14 }
 0xa86   :  { %v198_v4 = vsel %vm197_vm14, %v387_v17, 16 }
 0xa87   :  { %v199_v5 = vsel %vm29_vm2, %v198_v4, 2147483647 }
 0xa88   :  { %v201_v6 = vshra.s32 %v199_v5, 16  ;;  %v200_v8 = vand.u32 65535, %v199_v5 }
 0xa8a   :  { %v203_v7 = vcvt.s32.f32 %v201_v6  ;;  %v202_v10 = vcvt.s32.f32 %v200_v8 }
 0xa8c   :  { %204 = vmin.xlane.f32.xlu0 %v203_v7 }
 0xb19   :  { %v205_v9 = vpop.xlane.xlu0 %204 }
 0xb1a   :  { %vm206_vm15 = vcmp.eq.f32.partialorder %v203_v7, %v205_v9  ;;  %v211_v12 = vcvt.f32.s32 %v205_v9 }
 0xb1b   :  { %v207_v11 = vsel %vm206_vm15, %v202_v10, inf }
 0xb1c   :  { %208 = vmin.xlane.f32.xlu1 %v207_v11  ;;  %v212_v14 = vshll.u32 %v211_v12, 16 }
 0xba9   :  { %v209_v13 = vpop.xlane.xlu1 %208 }
 0xbaa   :  { %v210_v15 = vcvt.f32.s32 %v209_v13 }
 0xbac   :  { %v213_v16 = vadd.s32 %v212_v14, %v210_v15 }
 0xbae   :  { %v217_v18 = vsel %vm216_vm0, %v213_v16, %v215_v3  ;;  %vm218_vm1 = vcmp.eq.s32.totalorder %v387_v17, %v213_v16  ;;  %vm328_vm0 = vcmp.eq.s32.totalorder %v387_v17, 7 }
 0xbaf   :  { %v219_v19 = vsel %vm218_vm1, 2147483648, %v181_v54 }
 0xbb0   :  { %v220_v20 = vsel %vm29_vm2, %v219_v19, 2147483648 }
 0xbb1   :  { %v222_v21 = vshra.s32 %v220_v20, 16  ;;  %v221_v23 = vand.u32 65535, %v220_v20 }
 0xbb3   :  { %v224_v22 = vcvt.s32.f32 %v222_v21  ;;  %v223_v25 = vcvt.s32.f32 %v221_v23 }
 0xbb5   :  { %225 = vmax.xlane.f32.xlu0 %v224_v22 }
 0xc42   :  { %v226_v24 = vpop.xlane.xlu0 %225 }
 0xc43   :  { %vm227_vm3 = vcmp.eq.f32.partialorder %v224_v22, %v226_v24  ;;  %v232_v27 = vcvt.f32.s32 %v226_v24 }
 0xc44   :  { %v228_v26 = vsel %vm227_vm3, %v223_v25, -inf }
 0xc45   :  { %229 = vmax.xlane.f32.xlu1 %v228_v26  ;;  %v233_v29 = vshll.u32 %v232_v27, 16 }
 0xcd2   :  { %v230_v28 = vpop.xlane.xlu1 %229 }
 0xcd3   :  { %v231_v30 = vcvt.f32.s32 %v230_v28 }
 0xcd5   :  { %v234_v31 = vadd.s32 %v233_v29, %v231_v30 }
 0xcd7   :  { %vm235_vm5 = vcmp.eq.s32.totalorder %v219_v19, %v234_v31  ;;  %v253_v32 = vsel %vm252_vm4, %v234_v31, %v217_v18  ;;  %vm330_vm4 = vcmp.eq.s32.totalorder %v387_v17, 15 }
 0xcd8   :  { %v236_v33 = vsel %vm235_vm5, %v387_v17, 16 }
 0xcd9   :  { %v237_v34 = vsel %vm29_vm2, %v236_v33, 2147483647 }
 0xcda   :  { %v239_v35 = vshra.s32 %v237_v34, 16  ;;  %v238_v37 = vand.u32 65535, %v237_v34 }
 0xcdc   :  { %v241_v36 = vcvt.s32.f32 %v239_v35  ;;  %v240_v39 = vcvt.s32.f32 %v238_v37 }
 0xcde   :  { %242 = vmin.xlane.f32.xlu0 %v241_v36 }
 0xd6b   :  { %v243_v38 = vpop.xlane.xlu0 %242 }
 0xd6c   :  { %vm244_vm6 = vcmp.eq.f32.partialorder %v241_v36, %v243_v38  ;;  %v249_v41 = vcvt.f32.s32 %v243_v38 }
 0xd6d   :  { %v245_v40 = vsel %vm244_vm6, %v240_v39, inf }
 0xd6e   :  { %246 = vmin.xlane.f32.xlu1 %v245_v40  ;;  %v250_v43 = vshll.u32 %v249_v41, 16 }
 0xdfb   :  { %v247_v42 = vpop.xlane.xlu1 %246 }
 0xdfc   :  { %v248_v44 = vcvt.f32.s32 %v247_v42 }
 0xdfe   :  { %v251_v45 = vadd.s32 %v250_v43, %v248_v44 }
 0xe00   :  { %v255_v46 = vsel %vm254_vm7, %v251_v45, %v253_v32  ;;  %vm256_vm8 = vcmp.eq.s32.totalorder %v387_v17, %v251_v45 }
 0xe01   :  { %v257_v47 = vsel %vm256_vm8, 2147483648, %v219_v19 }
 0xe02   :  { %v258_v48 = vsel %vm29_vm2, %v257_v47, 2147483648 }
 0xe03   :  { %v260_v49 = vshra.s32 %v258_v48, 16  ;;  %v259_v51 = vand.u32 65535, %v258_v48 }
 0xe05   :  { %v262_v50 = vcvt.s32.f32 %v260_v49  ;;  %v261_v53 = vcvt.s32.f32 %v259_v51 }
 0xe07   :  { %263 = vmax.xlane.f32.xlu0 %v262_v50 }
 0xe94   :  { %v264_v52 = vpop.xlane.xlu0 %263 }
 0xe95   :  { %vm265_vm9 = vcmp.eq.f32.partialorder %v262_v50, %v264_v52  ;;  %v270_v55 = vcvt.f32.s32 %v264_v52 }
 0xe96   :  { %v266_v54 = vsel %vm265_vm9, %v261_v53, -inf }
 0xe97   :  { %267 = vmax.xlane.f32.xlu1 %v266_v54  ;;  %v271_v57 = vshll.u32 %v270_v55, 16 }
 0xf24   :  { %v268_v56 = vpop.xlane.xlu1 %267 }
 0xf25   :  { %v269_v58 = vcvt.f32.s32 %v268_v56 }
 0xf27   :  { %v272_v59 = vadd.s32 %v271_v57, %v269_v58 }
 0xf29   :  { %vm273_vm11 = vcmp.eq.s32.totalorder %v257_v47, %v272_v59  ;;  %v291_v60 = vsel %vm290_vm10, %v272_v59, %v255_v46 }
 0xf2a   :  { %v274_v61 = vsel %vm273_vm11, %v387_v17, 16 }
 0xf2b   :  { %v275_v62 = vsel %vm29_vm2, %v274_v61, 2147483647 }
 0xf2c   :  { %v277_v63 = vshra.s32 %v275_v62, 16  ;;  %v276_v1 = vand.u32 65535, %v275_v62 }
 0xf2e   :  { %v279_v0 = vcvt.s32.f32 %v277_v63  ;;  %v278_v3 = vcvt.s32.f32 %v276_v1 }
 0xf30   :  { %280 = vmin.xlane.f32.xlu0 %v279_v0 }
 0xfbd   :  { %v281_v2 = vpop.xlane.xlu0 %280 }
 0xfbe   :  { %vm282_vm12 = vcmp.eq.f32.partialorder %v279_v0, %v281_v2  ;;  %v287_v5 = vcvt.f32.s32 %v281_v2 }
 0xfbf   :  { %v283_v4 = vsel %vm282_vm12, %v278_v3, inf }
 0xfc0   :  { %284 = vmin.xlane.f32.xlu1 %v283_v4  ;;  %v288_v7 = vshll.u32 %v287_v5, 16 }
0x104d   :  { %v285_v6 = vpop.xlane.xlu1 %284 }
0x104e   :  { %v286_v8 = vcvt.f32.s32 %v285_v6 }
0x1050   :  { %v289_v9 = vadd.s32 %v288_v7, %v286_v8 }
0x1052   :  { %v293_v10 = vsel %vm292_vm13, %v289_v9, %v291_v60  ;;  %vm294_vm14 = vcmp.eq.s32.totalorder %v387_v17, %v289_v9 }
0x1053   :  { %v295_v11 = vsel %vm294_vm14, 2147483648, %v257_v47 }
0x1054   :  { %v296_v12 = vsel %vm29_vm2, %v295_v11, 2147483648 }
0x1055   :  { %v298_v13 = vshra.s32 %v296_v12, 16  ;;  %v297_v15 = vand.u32 65535, %v296_v12 }
0x1057   :  { %v300_v14 = vcvt.s32.f32 %v298_v13  ;;  %v299_v18 = vcvt.s32.f32 %v297_v15 }
0x1059   :  { %301 = vmax.xlane.f32.xlu0 %v300_v14 }
0x10e6   :  { %v302_v16 = vpop.xlane.xlu0 %301 }
0x10e7   :  { %vm303_vm15 = vcmp.eq.f32.partialorder %v300_v14, %v302_v16  ;;  %v308_v20 = vcvt.f32.s32 %v302_v16 }
0x10e8   :  { %v304_v19 = vsel %vm303_vm15, %v299_v18, -inf }
0x10e9   :  { %305 = vmax.xlane.f32.xlu1 %v304_v19  ;;  %v309_v22 = vshll.u32 %v308_v20, 16 }
0x1176   :  { %v306_v21 = vpop.xlane.xlu1 %305 }
0x1177   :  { %v307_v23 = vcvt.f32.s32 %v306_v21 }
0x1179   :  { %v310_v24 = vadd.s32 %v309_v22, %v307_v23 }
0x117b   :  { %vm311_vm1 = vcmp.eq.s32.totalorder %v295_v11, %v310_v24  ;;  %v329_v25 = vsel %vm328_vm0, %v310_v24, %v293_v10 }
0x117c   :  { %v312_v26 = vsel %vm311_vm1, %v387_v17, 16 }
0x117d   :  { %v313_v27 = vsel %vm29_vm2, %v312_v26, 2147483647 }
0x117e   :  { %v315_v28 = vshra.s32 %v313_v27, 16  ;;  %v314_v30 = vand.u32 65535, %v313_v27 }
0x1180   :  { %v317_v29 = vcvt.s32.f32 %v315_v28  ;;  %v316_v32 = vcvt.s32.f32 %v314_v30 }
0x1182   :  { %318 = vmin.xlane.f32.xlu0 %v317_v29 }
0x120f   :  { %v319_v31 = vpop.xlane.xlu0 %318 }
0x1210   :  { %vm320_vm3 = vcmp.eq.f32.partialorder %v317_v29, %v319_v31  ;;  %v325_v34 = vcvt.f32.s32 %v319_v31 }
0x1211   :  { %v321_v33 = vsel %vm320_vm3, %v316_v32, inf }
0x1212   :  { %322 = vmin.xlane.f32.xlu1 %v321_v33  ;;  %v326_v36 = vshll.u32 %v325_v34, 16 }
0x129f   :  { %v323_v35 = vpop.xlane.xlu1 %322 }
0x12a0   :  { %v324_v37 = vcvt.f32.s32 %v323_v35 }
0x12a2   :  { %v327_v38 = vadd.s32 %v326_v36, %v324_v37 }
0x12a4   :  { %v331_v39 = vsel %vm330_vm4, %v327_v38, %v329_v25 }
0x12a5   :  { %332 = vst.msk [vmem:[%s440_s1] sm:$0xff] %vm29_vm2, %v331_v39 }
0x12a6   :  { %337 = vsyncpa [#allocation3], 1 }

</bundles_post_ra>
